<compile_context>
chip_gen: v7x
topology: tpu7x:2x2x1
jax: 0.10.0
libtpu: 0.0.40
codegen_flags: <defaults>
</compile_context>

<pallas_src>
import functools
import math

import jax
import jax.numpy as jnp
from jax.experimental import pallas as pl
from jax.experimental.pallas import tpu as pltpu


def _round_up(v: int, m: int) -> int:
    return ((v + m - 1) // m) * m


def _vmem_cap_bytes() -> int:
    """Generation-aware VMEM cap: v7x has 64 MiB physical, v5e/v6e have 128 MiB."""
    try:
        kind = jax.devices()[0].device_kind.lower()
    except Exception:  # pragma: no cover - defensive
        kind = ""
    if "v7" in kind:
        return 44 << 20
    return 96 << 20


def _linear_kernel_fullk(x_ref, w_ref, b_ref, o_ref, *, cast_x):
    """One (tm, tn) output tile; whole K contraction in one shot (no accumulator)."""
    x = x_ref[...]
    if cast_x:
        x = x.astype(jnp.bfloat16)
    acc = jnp.dot(x, w_ref[...], preferred_element_type=jnp.float32)
    o_ref[...] = (acc + b_ref[...]).astype(o_ref.dtype)


def _linear_kernel_ktiled(x_ref, w_ref, b_ref, o_ref, acc_ref, *, cast_x):
    """One (tm, tn) output tile; accumulates over the K grid axis (fallback path)."""
    k = pl.program_id(2)

    @pl.when(k == 0)
    def _init():
        acc_ref[...] = jnp.zeros_like(acc_ref)

    x = x_ref[...]
    if cast_x:
        x = x.astype(jnp.bfloat16)
    acc_ref[...] += jnp.dot(x, w_ref[...], preferred_element_type=jnp.float32)

    @pl.when(k == pl.num_programs(2) - 1)
    def _store():
        o_ref[...] = (acc_ref[...] + b_ref[...]).astype(o_ref.dtype)


@functools.partial(
    jax.jit,
    static_argnames=("block_m", "block_n", "block_k", "prefer_full_k", "out_dtype"),
)
def linear_forward(x, weight, bias, *, block_m=512, block_n=1024, block_k=2048,
                   prefer_full_k=True, out_dtype=None):
    """x: (B, dim_in); weight: (dim_out, dim_in) [PyTorch layout]; bias: (dim_out,)."""
    B, K = x.shape
    N, K_w = weight.shape
    assert K == K_w, (K, K_w)
    out_dtype = x.dtype if out_dtype is None else jnp.dtype(out_dtype)
    o_bytes = jnp.dtype(out_dtype).itemsize
    cap = _vmem_cap_bytes()

    # ---- static tile planning -------------------------------------------------
    block_m = _round_up(block_m, 8)
    block_n = _round_up(block_n, 128)
    block_k = _round_up(block_k, 128)

    # N (dim_out) padded to a lane-dense multiple of 128 and of the N tile.
    n_pad = _round_up(max(N, 128), 128)
    tn = min(block_n, n_pad)
    n_pad = _round_up(n_pad, tn)

    k_pad = _round_up(K, 128)

    # M tile: as large as useful, 8-aligned.  The last (ragged) M block reads a
    # few undefined x rows but their output rows are write-masked by Pallas.
    tm = min(block_m, _round_up(B, 8))

    m_blocks = pl.cdiv(B, tm)
    n_blocks = n_pad // tn

    # Guarantee >=2 parallel (M x N) blocks when possible so both v7x TensorCores
    # get work (the M/N axes are "parallel").
    if m_blocks * n_blocks == 1:
        if n_pad >= 256:
            half = _round_up(n_pad // 2, 128)
            if n_pad % half == 0:
                tn = half
                n_blocks = n_pad // tn
        elif _round_up(B, 8) >= 16:
            tm = _round_up(pl.cdiv(B, 2), 8)
            m_blocks = pl.cdiv(B, tm)

    # If x is consumed only once per element (single N tile, e.g. dim_out=1 GEMV),
    # keep it in its original dtype in HBM and cast to bf16 inside the kernel;
    # otherwise cast once in the wrapper so re-reads across N tiles move bf16.
    cast_x_in_kernel = (n_blocks == 1) and (x.dtype != jnp.bfloat16)
    x_eb = x.dtype.itemsize if cast_x_in_kernel else 2

    # Prefer taking the whole K reduction per grid step (no accumulator scratch,
    # no init/store epilogue) when the double-buffered tiles fit ~half the cap.
    fullk_bytes = (2 * tm * k_pad * x_eb        # x tile, double-buffered
                   + 2 * k_pad * tn * 2         # bf16 weight tile, double-buffered
                   + 2 * tn * 4                 # bias tile
                   + 2 * tm * tn * o_bytes)     # output tile
    use_full_k = prefer_full_k and (fullk_bytes <= cap // 2)

    if use_full_k:
        tk = k_pad
        k_blocks = 1
        working = fullk_bytes
    else:
        tk = min(block_k, k_pad)
        k_pad = _round_up(K, tk)
        k_blocks = k_pad // tk
        working = (2 * tm * tk * x_eb + 2 * tk * tn * 2 + 2 * tn * 4
                   + 2 * tm * tn * o_bytes + tm * tn * 4)  # + f32 accumulator

    vmem_bytes = int(min(cap, max(working + (8 << 20), 32 << 20)))

    # ---- parameter / input prep -----------------------------------------------
    # Weight: cast once to bf16, transpose to (K, N) so the kernel uses the
    # standard (1,0) contraction (no chance of a per-step in-kernel transpose).
    # TODO(synk): in a real model, cache this prepared (padded, transposed, bf16)
    # weight across calls at parameter-load time instead of per forward call.
    w_kn = weight.astype(jnp.bfloat16).T
    if (k_pad != K) or (n_pad != N):
        w_kn = jnp.pad(w_kn, ((0, k_pad - K), (0, n_pad - N)))
    b_row = bias.astype(jnp.float32).reshape(1, N)
    if n_pad != N:
        b_row = jnp.pad(b_row, ((0, 0), (0, n_pad - N)))

    x_c = x if cast_x_in_kernel else x.astype(jnp.bfloat16)
    if k_pad != K:
        x_c = jnp.pad(x_c, ((0, 0), (0, k_pad - K)))

    # ---- pallas call ------------------------------------------------------------
    if use_full_k:
        kernel = functools.partial(_linear_kernel_fullk, cast_x=cast_x_in_kernel)
        out_padded = pl.pallas_call(
            kernel,
            out_shape=jax.ShapeDtypeStruct((B, n_pad), out_dtype),
            grid_spec=pltpu.PrefetchScalarGridSpec(
                num_scalar_prefetch=0,
                grid=(m_blocks, n_blocks),
                in_specs=[
                    pl.BlockSpec((tm, k_pad), lambda i, j: (i, 0)),   # x
                    pl.BlockSpec((k_pad, tn), lambda i, j: (0, j)),   # weight (K, N)
                    pl.BlockSpec((1, tn), lambda i, j: (0, j)),       # bias
                ],
                out_specs=pl.BlockSpec((tm, tn), lambda i, j: (i, j)),
            ),
            compiler_params=pltpu.CompilerParams(
                dimension_semantics=("parallel", "parallel"),
                vmem_limit_bytes=vmem_bytes,
            ),
        )(x_c, w_kn, b_row)
    else:
        kernel = functools.partial(_linear_kernel_ktiled, cast_x=cast_x_in_kernel)
        out_padded = pl.pallas_call(
            kernel,
            out_shape=jax.ShapeDtypeStruct((B, n_pad), out_dtype),
            grid_spec=pltpu.PrefetchScalarGridSpec(
                num_scalar_prefetch=0,
                grid=(m_blocks, n_blocks, k_blocks),
                in_specs=[
                    pl.BlockSpec((tm, tk), lambda i, j, k: (i, k)),   # x
                    pl.BlockSpec((tk, tn), lambda i, j, k: (k, j)),   # weight (K, N)
                    pl.BlockSpec((1, tn), lambda i, j, k: (0, j)),    # bias
                ],
                out_specs=pl.BlockSpec((tm, tn), lambda i, j, k: (i, j)),
                scratch_shapes=[pltpu.VMEM((tm, tn), jnp.float32)],
            ),
            compiler_params=pltpu.CompilerParams(
                dimension_semantics=("parallel", "parallel", "arbitrary"),
                vmem_limit_bytes=vmem_bytes,
            ),
        )(x_c, w_kn, b_row)

    return out_padded[:, :N] if n_pad != N else out_padded


def _reference(x, weight, bias):
    # Reference with the same bf16 input quantization the kernel uses (f32 accumulate).
    xq = x.astype(jnp.bfloat16).astype(jnp.float32)
    wq = weight.astype(jnp.bfloat16).astype(jnp.float32)
    return xq @ wq.T + bias


if __name__ == "__main__":
    key = jax.random.PRNGKey(0)

    # --- shapes implied by the module: nn.Linear(dim_in=256, dim_out=1) --------
    dim_in, dim_out, batch = 256, 1, 8
    kx, kw, kb, k2 = jax.random.split(key, 4)

    bound = 1.0 / math.sqrt(dim_in)
    weight = jax.random.uniform(kw, (dim_out, dim_in), jnp.float32, -bound, bound)
    bias = jax.random.uniform(kb, (dim_out,), jnp.float32, -bound, bound)
    x = jax.random.normal(kx, (batch, dim_in), jnp.float32)

    y = linear_forward(x, weight, bias)
    jax.block_until_ready(y)
    y_ref = _reference(x, weight, bias)
    assert y.shape == (batch, dim_out)
    assert jnp.allclose(y, y_ref, atol=2e-3, rtol=2e-3)

    # --- ragged M / K / N path (B=300 exercises the masked last-M-block writes) -
    b2, k2_in, n2 = 300, 300, 130
    ka, kb2, kc = jax.random.split(k2, 3)
    bound2 = 1.0 / math.sqrt(k2_in)
    w2 = jax.random.uniform(ka, (n2, k2_in), jnp.float32, -bound2, bound2)
    bb2 = jax.random.uniform(kb2, (n2,), jnp.float32, -bound2, bound2)
    x2 = jax.random.normal(kc, (b2, k2_in), jnp.float32)

    y2 = linear_forward(x2, w2, bb2)
    jax.block_until_ready(y2)
    y2_ref = _reference(x2, w2, bb2)
    assert y2.shape == (b2, n2)
    assert jnp.allclose(y2, y2_ref, atol=2e-3, rtol=2e-3)

    # --- force the K-tiled accumulator fallback path -----------------------------
    y3 = linear_forward(x2, w2, bb2, block_k=128, prefer_full_k=False)
    jax.block_until_ready(y3)
    assert y3.shape == (b2, n2)
    assert jnp.allclose(y3, y2_ref, atol=2e-3, rtol=2e-3)

    print("KERNEL_OK")
</pallas_src>

<mosaic_0001>
module attributes {stable_mosaic.version = 11 : i64} {
  func.func @_linear_kernel_fullk(%arg0: i32, %arg1: i32, %arg2: memref<8x256xf32, #tpu.memory_space<vmem>>, %arg3: memref<256x128xbf16, #tpu.memory_space<vmem>>, %arg4: memref<1x128xf32, #tpu.memory_space<vmem>>, %arg5: memref<8x128xf32, #tpu.memory_space<vmem>>) attributes {dimension_semantics = [#tpu.dimension_semantics<parallel>, #tpu.dimension_semantics<parallel>], iteration_bounds = array<i64: 1, 1>, scalar_prefetch = 0 : i64, scratch_operands = 0 : i64, tpu.core_type = #tpu.core_type<tc>, window_params = [{transform_indices = @transform_0, window_bounds = array<i64: 8, 256>}, {transform_indices = @transform_1, window_bounds = array<i64: 256, 128>}, {transform_indices = @transform_2, window_bounds = array<i64: 1, 128>}, {transform_indices = @transform_3, window_bounds = array<i64: 8, 128>}]} {
    %c0 = arith.constant 0 : index
    %c0_0 = arith.constant 0 : index
    %0 = vector.load %arg2[%c0, %c0_0] : memref<8x256xf32, #tpu.memory_space<vmem>>, vector<8x256xf32>
    %1 = arith.truncf %0 : vector<8x256xf32> to vector<8x256xbf16>
    %c0_1 = arith.constant 0 : index
    %c0_2 = arith.constant 0 : index
    %2 = vector.load %arg3[%c0_1, %c0_2] : memref<256x128xbf16, #tpu.memory_space<vmem>>, vector<256x128xbf16>
    %cst = arith.constant dense<0.000000e+00> : vector<8x128xf32>
    %3 = tpu.matmul %1, %2, %cst {dimension_numbers = #tpu.dot_dimension_numbers<[1], [0], [0], [1], [0, 0, 1, 1], [], []>} : vector<8x256xbf16>, vector<256x128xbf16>, vector<8x128xf32> -> vector<8x128xf32>
    %c0_3 = arith.constant 0 : index
    %c0_4 = arith.constant 0 : index
    %4 = vector.load %arg4[%c0_3, %c0_4] : memref<1x128xf32, #tpu.memory_space<vmem>>, vector<1x128xf32>
    %5 = vector.broadcast %4 : vector<1x128xf32> to vector<8x128xf32>
    %6 = arith.addf %3, %5 : vector<8x128xf32>
    %c0_5 = arith.constant 0 : index
    %c0_6 = arith.constant 0 : index
    %7 = vector.load %arg5[%c0_5, %c0_6] : memref<8x128xf32, #tpu.memory_space<vmem>>, vector<8x128xf32>
    tpu.vector_store %arg5[%c0_5, %c0_6], %6 {strides = array<i32>} : memref<8x128xf32, #tpu.memory_space<vmem>>, vector<8x128xf32>,
    return
  }
  func.func @transform_0(%arg0: i32, %arg1: i32) -> (i32, i32) {
    %c0_i32 = arith.constant 0 : i32
    %c0_i32_0 = arith.constant 0 : i32
    return %arg0, %c0_i32 : i32, i32
  }
  func.func @transform_1(%arg0: i32, %arg1: i32) -> (i32, i32) {
    %c0_i32 = arith.constant 0 : i32
    %c0_i32_0 = arith.constant 0 : i32
    return %c0_i32, %arg1 : i32, i32
  }
  func.func @transform_2(%arg0: i32, %arg1: i32) -> (i32, i32) {
    %c0_i32 = arith.constant 0 : i32
    %c0_i32_0 = arith.constant 0 : i32
    return %c0_i32, %arg1 : i32, i32
  }
  func.func @transform_3(%arg0: i32, %arg1: i32) -> (i32, i32) {
    %c0_i32 = arith.constant 0 : i32
    return %arg0, %arg1 : i32, i32
  }
}

</mosaic_0001>

<bundles_post_ra>
// kernel: linear_forward.1
= control target key start
LH: loop header
LB: loop body
LE: loop exit
PB: predicated region body
PF: predicated region fallthrough
CT: control target
= control target key end

     0   :  { %s334_s1 = inlined_call_operand.vmem [shape: bf16[256,128], index: 1, kind: input, shape index: {}]   ;;  %s335_s0 = inlined_call_operand.vmem [shape: f32[8,256], index: 0, kind: input, shape index: {}]   ;;  %s336_s2 = inlined_call_operand.vmem [shape: f32[1,128], index: 2, kind: input, shape index: {}]   ;;  %s337_s3 = inlined_call_operand.vmem [shape: f32[8,128], index: 3, kind: output, shape index: {}]  }
   0x1   :  { %v238_v0 = vld [vmem:[%s334_s1 + $0x40] sm:$0xff]   ;;  %v240_v2 = vld [vmem:[%s334_s1 + $0x48] sm:$0xff]   ;;  %v242_v4 = vld [vmem:[%s334_s1 + $0x50] sm:$0xff]  }
   0x2   :  { %v239_v1 = vld [vmem:[%s334_s1] sm:$0xff]   ;;  %216 = vmatprep.subr.bf16.mxu0 %v238_v0  ;;  %v241_v3 = vld [vmem:[%s334_s1 + $0x8] sm:$0xff]   ;;  %v243_v5 = vld [vmem:[%s334_s1 + $0x10] sm:$0xff]  }
   0x3   :  { %217 = vmatpush3.bf16.msra.mxu0 %v239_v1  ;;  %v244_v6 = vld [vmem:[%s334_s1 + $0x58] sm:$0xff]   ;;  %v246_v8 = vld [vmem:[%s334_s1 + $0x60] sm:$0xff]   ;;  %v248_v10 = vld [vmem:[%s334_s1 + $0x68] sm:$0xff]  }
   0x4   :  { %218 = vmatprep.subr.bf16.mxu0 %v240_v2  ;;  %v245_v7 = vld [vmem:[%s334_s1 + $0x18] sm:$0xff]   ;;  %v247_v9 = vld [vmem:[%s334_s1 + $0x20] sm:$0xff]   ;;  %v16_v11 = vld [vmem:[%s335_s0 + $0x8] sm:$0xff] }
   0x5   :  { %v18_v12 = vpack.c.bf16 %v16_v11, %v16_v11  ;;  %v249_v13 = vld [vmem:[%s334_s1 + $0x28] sm:$0xff]   ;;  %v250_v14 = vld [vmem:[%s334_s1 + $0x70] sm:$0xff]   ;;  %v252_v16 = vld [vmem:[%s334_s1 + $0x78] sm:$0xff]  }
   0x6   :  { %v251_v15 = vld [vmem:[%s334_s1 + $0x30] sm:$0xff]   ;;  %v253_v17 = vld [vmem:[%s334_s1 + $0x38] sm:$0xff]   ;;  %v15_v18 = vld [vmem:[%s335_s0] sm:$0xff] }
   0x7   :  { %219 = vmatpush3.bf16.msra.mxu0 %v241_v3  ;;  %186 = vmatprep.mubr.bf16.mxu0 %v18_v12  ;;  %v17_v19 = vpack.c.bf16 %v15_v18, %v15_v18  ;;  %v199_v21 = vld [vmem:[%s336_s2] ss:$0 sm:$0xff] }
   0x8   :  { %220 = vmatprep.subr.bf16.mxu0 %v242_v4 }
   0xb   :  { %221 = vmatpush3.bf16.msra.mxu0 %v243_v5 }
   0xc   :  { %222 = vmatprep.subr.bf16.mxu0 %v244_v6 }
   0xf   :  { %223 = vmatpush3.bf16.msra.mxu0 %v245_v7 }
  0x10   :  { %224 = vmatprep.subr.bf16.mxu0 %v246_v8 }
  0x13   :  { %225 = vmatpush3.bf16.msra.mxu0 %v247_v9 }
  0x14   :  { %226 = vmatprep.subr.bf16.mxu0 %v248_v10 }
  0x17   :  { %227 = vmatpush3.bf16.msra.mxu0 %v249_v13 }
  0x18   :  { %228 = vmatprep.subr.bf16.mxu0 %v250_v14 }
  0x1b   :  { %229 = vmatpush3.bf16.msra.mxu0 %v251_v15 }
  0x1c   :  { %230 = vmatprep.subr.bf16.mxu0 %v252_v16 }
  0x1f   :  { %231 = vmatpush3.bf16.msra.mxu0 %v253_v17 }
  0x22   :  { %187 = vmatmul.mubr.bf16.vlgmr.msra.gmra.mrb[0].mxu0 %v17_v19 }
  0xf5   :  { %v232_v20 = vpop.f32.mrb[0].mxu0 }
  0xf6   :  { %v233_v22 = vpop.f32.mrb[1].mxu0 }
  0xf7   :  { %v234_v23 = vadd.f32 %v233_v22, %v232_v20  ;;  %v235_v24 = vpop.f32.mrb[2].mxu0 }
  0xf8   :  { %v236_v25 = vpop.f32.mrb[3].mxu0 }
  0xf9   :  { %v189_v26 = vadd.f32 %v234_v23, %v199_v21 }
  0xfb   :  { %194 = vst [vmem:[%s337_s3] sm:$0xff] %v189_v26 }

</bundles_post_ra>
